<compile_context>
chip_gen: v6e
topology: v6e:2x2x1
jax: 0.10.0
libtpu: 0.0.40
codegen_flags: <defaults>
</compile_context>

<pallas_src>
import functools

import jax
import jax.numpy as jnp
from jax.experimental import pallas as pl
from jax.experimental.pallas import tpu as pltpu


def _threshold_kernel(x_ref, o_ref, *, threshold, value):
    x = x_ref[...]
    thr = jnp.asarray(threshold, dtype=x.dtype)
    val = jnp.asarray(value, dtype=x.dtype)
    o_ref[...] = jnp.where(x > thr, x, val)


_LANES = 128
# Anything at or below this goes through the single-block (no-grid) path.
_SINGLE_BLOCK_MAX_BYTES = 2 * 1024 * 1024
# Streaming path: ~4 MiB lane-dense blocks (good for v7x's 3.2 TB/s HBM; with
# in+out double-buffered that's ~16 MiB, within the raised VMEM limit below).
_TARGET_BLOCK_BYTES = 4 * 1024 * 1024
_VMEM_LIMIT_BYTES = 32 * 1024 * 1024  # raise v5e's 16 MiB scoped default


def _round_up(x, m):
    return ((x + m - 1) // m) * m


def _pick_width(n):
    """Largest lane width in {512, 256, 128} dividing n (None if none does)."""
    for w in (512, 256, 128):
        if n % w == 0:
            return w
    return None


def threshold_pallas(x, threshold=0.0, value=0.0, inplace=False):
    """Elementwise torch.nn.functional.threshold via Pallas TPU kernels."""
    orig_shape = x.shape
    dtype = x.dtype
    n = x.size
    itemsize = jnp.dtype(dtype).itemsize
    nbytes = n * itemsize

    # threshold/value are fixed at Model construction time, so they are baked
    # as compile-time constants.
    # TODO(synk): a runtime-varying threshold/value would be passed as SMEM
    # scalars instead to avoid a Mosaic recompile per distinct pair.
    kernel = functools.partial(_threshold_kernel, threshold=threshold, value=value)

    x_flat = jnp.ravel(x)

    if nbytes <= _SINGLE_BLOCK_MAX_BYTES:
        # ---- Small path: whole slab in one VMEM block, no grid. ----
        pad = (-n) % _LANES
        if pad:
            x_flat = jnp.pad(x_flat, (0, pad))
        total = x_flat.size
        w = _pick_width(total) or _LANES
        rows = total // w
        x2d = x_flat.reshape(rows, w)

        out2d = pl.pallas_call(
            kernel,
            out_shape=jax.ShapeDtypeStruct((rows, w), dtype),
            in_specs=[pl.BlockSpec(memory_space=pltpu.MemorySpace.VMEM)],
            out_specs=pl.BlockSpec(memory_space=pltpu.MemorySpace.VMEM),
        )(x2d)

        out_flat = out2d.reshape(-1)
        if pad:
            out_flat = out_flat[:n]
        return out_flat.reshape(orig_shape)

    # ---- Large path: lane-dense tiled streaming, no pad/slice in the common
    # case (flat size a multiple of 128). ----
    w = _pick_width(n)
    trailing_pad = 0
    if w is None:
        # Rare ragged case: flat size not a multiple of 128. Pad the tail once.
        # TODO(synk): a fully copy-free ragged path would need a tiny separate
        # tail kernel + dynamic_update_slice; not worth it for < 128 elements.
        trailing_pad = (-n) % _LANES
        x_flat = jnp.pad(x_flat, (0, trailing_pad))
        w = _LANES
    rows = x_flat.size // w
    x2d = x_flat.reshape(rows, w)  # contiguous reshape: no data movement

    # ~4 MiB blocks; row count a multiple of 32 (valid sublane tiling for
    # f32/bf16/int8), clamped so a single block never wildly exceeds the array.
    tile_rows = max(32, (_TARGET_BLOCK_BYTES // (w * itemsize)) // 32 * 32)
    tile_rows = min(tile_rows, _round_up(rows, 32))
    grid = (pl.cdiv(rows, tile_rows),)  # ragged last block handled by masking

    io_alias = {0: 0} if inplace else {}
    out2d = pl.pallas_call(
        kernel,
        out_shape=jax.ShapeDtypeStruct((rows, w), dtype),
        grid=grid,
        in_specs=[pl.BlockSpec((tile_rows, w), lambda i: (i, 0))],
        out_specs=pl.BlockSpec((tile_rows, w), lambda i: (i, 0)),
        input_output_aliases=io_alias,
        compiler_params=pltpu.CompilerParams(
            dimension_semantics=("parallel",),
            vmem_limit_bytes=_VMEM_LIMIT_BYTES,
        ),
    )(x2d)

    out_flat = out2d.reshape(-1)
    if trailing_pad:
        out_flat = out_flat[:n]
    return out_flat.reshape(orig_shape)


def _ref(x, threshold, value):
    return jnp.where(x > threshold, x, jnp.asarray(value, x.dtype))


if __name__ == "__main__":
    key = jax.random.PRNGKey(0)

    # NCHW shape matching the PyTorch test: (2, 4, 16, 16) -> small path.
    x = jax.random.normal(key, (2, 4, 16, 16), dtype=jnp.float32)
    out = jax.block_until_ready(threshold_pallas(x, threshold=0.0, value=0.0))
    assert out.shape == x.shape and out.dtype == x.dtype
    assert jnp.array_equal(out, _ref(x, 0.0, 0.0)), "mismatch (small path)"

    # Small path with a flat size not divisible by 128.
    x_odd = jax.random.normal(jax.random.PRNGKey(1), (3, 5, 7), dtype=jnp.float32)
    out_odd = jax.block_until_ready(threshold_pallas(x_odd, 0.1, -2.0))
    assert jnp.array_equal(out_odd, _ref(x_odd, 0.1, -2.0)), "mismatch (small odd)"

    # Large path: > 2 MiB, flat size divisible by 512, ragged last row-block
    # (rows = 2060, tile_rows = 2048) -> exercises cdiv-grid masking, no pad.
    x_big = jax.random.normal(jax.random.PRNGKey(2), (1024, 1030), dtype=jnp.float32)
    out_big = jax.block_until_ready(threshold_pallas(x_big, 0.25, -1.0))
    assert jnp.array_equal(out_big, _ref(x_big, 0.25, -1.0)), "mismatch (large path)"

    # Large path, flat size NOT divisible by 128 -> rare tail-pad fallback.
    x_rag = jax.random.normal(jax.random.PRNGKey(3), (1000, 1001), dtype=jnp.float32)
    out_rag = jax.block_until_ready(threshold_pallas(x_rag, -0.5, 3.0))
    assert jnp.array_equal(out_rag, _ref(x_rag, -0.5, 3.0)), "mismatch (large ragged)"

    print("KERNEL_OK")
</pallas_src>

<mosaic_0001>
module attributes {stable_mosaic.version = 11 : i64} {
  func.func @_threshold_kernel(%arg0: memref<4x512xf32, #tpu.memory_space<vmem>>, %arg1: memref<4x512xf32, #tpu.memory_space<vmem>>) attributes {dimension_semantics = [], scalar_prefetch = 0 : i64, scratch_operands = 0 : i64, tpu.core_type = #tpu.core_type<tc>} {
    %c0 = arith.constant 0 : index
    %c0_0 = arith.constant 0 : index
    %0 = vector.load %arg0[%c0, %c0_0] : memref<4x512xf32, #tpu.memory_space<vmem>>, vector<4x512xf32>
    %cst = arith.constant 0.000000e+00 : f32
    %1 = vector.broadcast %cst : f32 to vector<4x512xf32>
    %2 = arith.cmpf ogt, %0, %1 : vector<4x512xf32>
    %cst_1 = arith.constant 0.000000e+00 : f32
    %3 = vector.broadcast %cst_1 : f32 to vector<4x512xf32>
    %4 = arith.select %2, %0, %3 : vector<4x512xi1>, vector<4x512xf32>
    %c0_2 = arith.constant 0 : index
    %c0_3 = arith.constant 0 : index
    %5 = vector.load %arg1[%c0_2, %c0_3] : memref<4x512xf32, #tpu.memory_space<vmem>>, vector<4x512xf32>
    tpu.vector_store %arg1[%c0_2, %c0_3], %4 {strides = array<i32>} : memref<4x512xf32, #tpu.memory_space<vmem>>, vector<4x512xf32>,
    return
  }
}

</mosaic_0001>

<bundles_post_ra>
// kernel: tpu_custom_call.1
= control target key start
LH: loop header
LB: loop body
LE: loop exit
PB: predicated region body
PF: predicated region fallthrough
CT: control target
= control target key end

     0   :  { %6 = vsyncpa [#allocation3], 0  ;;  %s108_s0 = inlined_call_operand.hbm [shape: f32[4,512], index: 0, kind: input, shape index: {}]   ;;  %s109_s1 = inlined_call_operand.hbm [shape: f32[4,512], index: 1, kind: output, shape index: {}]  }
   0x1   :  { %7 = vsyncpa [#allocation4], 0  ;;  %s90_s6 = smov [#allocation2]  }
   0x2   :  { %s14_s7 = sshll.u32 %s90_s6, 4  ;;  %s15_s7 = int_to_ptr.vmem [resolvable:$true] %s14_s7 }
   0x3   :  { %s54_s8 = scalar_lea.vmem %s15_s7, 256  ;;  %p59_p1 = scmp.lt.s32.totalorder %s15_s7, %s15_s7 }
   0x4   :  { %p55_p0 = scmp.ne.s32.totalorder %s15_s7, %s54_s8  ;;  %p60_p2 = scmp.lt.s32.totalorder %s54_s8, %s54_s8 }
   0x6   :  { %p61_p3 = por %p60_p2, %p59_p1 }
   0x8   :  { %p62_p4 = pnand %p61_p3, %p55_p0 }
   0xa   :  { %65 = shalt.err (!%p62_p4)
}
   0xb   :  { %17 = dma.hbm_to_vmem [thread:$0]  %s108_s0, 256, %s15_s7, [#allocation3]  }
   0xc   :  { %86 = dma.done.wait [#allocation3], 256  }
   0xd   :  { %87 = vsyncadd [#allocation3], 4294967040  ;;  %s91_s11 = smov [#allocation5]   ;;  %v21_v0 = vld [vmem:[#allocation2] sm:$0xff]  ;;  %v22_v1 = vld [vmem:[#allocation2 + $0x8] sm:$0xff] }
   0xe   :  { %s35_s12 = sshll.u32 %s91_s11, 4  ;;  %vm23_vm0 = vcmp.gt.f32.partialorder %v21_v0, 0.0  ;;  %vm24_vm1 = vcmp.gt.f32.partialorder %v22_v1, 0.0  ;;  %s36_s12 = int_to_ptr.vmem [resolvable:$true] %s35_s12 }
   0xf   :  { %v25_v2 = vsel %vm23_vm0, %v21_v0, 0.0  ;;  %v26_v3 = vsel %vm24_vm1, %v22_v1, 0.0  ;;  %s66_s13 = scalar_lea.vmem %s36_s12, 256  ;;  %p71_p6 = scmp.lt.s32.totalorder %s36_s12, %s36_s12 }
  0x10   :  { %27 = vst [vmem:[#allocation5] sm:$0xff] %v25_v2  ;;  %28 = vst [vmem:[#allocation5 + $0x8] sm:$0xff] %v26_v3  ;;  %p67_p5 = scmp.ne.s32.totalorder %s36_s12, %s66_s13  ;;  %p72_p7 = scmp.lt.s32.totalorder %s66_s13, %s66_s13 }
  0x12   :  { %p73_p8 = por %p72_p7, %p71_p6 }
  0x14   :  { %p74_p9 = pnand %p73_p8, %p67_p5 }
  0x16   :  { %77 = shalt.err (!%p74_p9)
}
  0x17   :  { %38 = dma.vmem_to_hbm [thread:$0]  %s36_s12, 256, %s109_s1, [#allocation4]  }
  0x18   :  { %88 = dma.done.wait [#allocation4], 256  }
  0x19   :  { %89 = vsyncadd [#allocation4], 4294967040 }
  0x1a   :  { %42 = vsyncpa [#allocation3], 1 }
  0x1b   :  { %43 = vsyncpa [#allocation4], 1 }

</bundles_post_ra>
